<compile_context>
chip_gen: v6e
topology: v6e:2x2x1
jax: 0.10.0
libtpu: 0.0.40
codegen_flags: <defaults>
</compile_context>

<pallas_src>
import functools

import jax
import jax.numpy as jnp
from jax.experimental import pallas as pl
from jax.experimental.pallas import tpu as pltpu


def _basic_block_kernel(x_ref, w1_ref, b1_ref, w2_ref, b2_ref, o_ref,
                        p1_ref, p2_ref, *, W, L1):
    """Fused conv3x3(valid) -> relu -> conv3x3(valid) -> relu.

    x_ref : (N, Cin, L0)   zero-padded flat NCHW input   (L0 = L1 + 2W + 2)
    w1_ref: (C1, 9*Cin)    conv1 weights, inner index = (kh*3+kw)*Cin + cin
    b1_ref: (C1, 1)
    w2_ref: (C1, 9*C1)     conv2 weights, inner index = (kh*3+kw)*C1 + c
    b2_ref: (C1, 1)
    o_ref : (N, C1, L2)    conv2 output on the W-strided flat grid (L2 = H2*W)
    p1_ref: (9*Cin, N*L1)  VMEM scratch: im2col patches of x
    p2_ref: (9*C1,  N*L2)  VMEM scratch: im2col patches of relu(conv1)
    """
    N, Cin, _ = x_ref.shape
    _, C1, L2 = o_ref.shape
    taps = [kh * W + kw for kh in range(3) for kw in range(3)]  # flat tap offsets

    # ---- conv1: build im2col once, one MXU matmul for the whole batch ----
    for n in range(N):
        x_n = x_ref[n]                                            # (Cin, L0)
        for t, d in enumerate(taps):
            p1_ref[t * Cin:(t + 1) * Cin, n * L1:(n + 1) * L1] = x_n[:, d:d + L1]

    y1 = jnp.dot(w1_ref[...], p1_ref[...],
                 preferred_element_type=jnp.float32)              # (C1, N*L1)
    h1 = jnp.maximum(y1 + b1_ref[...], 0.0)                       # bias: lane bcast

    # ---- conv2: same pattern on the (still W-strided) conv1 output ----
    for n in range(N):
        for t, d in enumerate(taps):
            base = n * L1 + d
            p2_ref[t * C1:(t + 1) * C1, n * L2:(n + 1) * L2] = h1[:, base:base + L2]

    y2 = jnp.dot(w2_ref[...], p2_ref[...],
                 preferred_element_type=jnp.float32)              # (C1, N*L2)
    out = jnp.maximum(y2 + b2_ref[...], 0.0)

    for n in range(N):
        o_ref[n] = out[:, n * L2:(n + 1) * L2].astype(o_ref.dtype)


@jax.jit
def basic_block(x_nchw, w1_oihw, b1, w2_oihw, b2):
    """BasicBlock forward. x_nchw: (N, Cin, H, W) f32 -> (N, C1, H-4, W-4)."""
    N, Cin, H, W = x_nchw.shape
    C1 = w1_oihw.shape[0]
    H2, W2 = H - 4, W - 4

    d_max = 2 * W + 2        # largest flat tap offset (kh=2, kw=2)
    L2 = H2 * W              # output row length (reshapes cleanly to (H2, W))
    L1 = L2 + d_max          # conv1 columns the conv2 taps may read
    L0 = L1 + d_max          # input columns the conv1 taps may read (= H*W + 4)

    # ---- wrapper-side glue (free XLA ops) ----
    x_flat = jnp.pad(x_nchw.reshape(N, Cin, H * W),
                     ((0, 0), (0, 0), (0, L0 - H * W)))
    # OIHW -> (C1, kh, kw, cin) -> (C1, 9*Cin): matches the patch row ordering.
    w1f = jnp.transpose(w1_oihw, (0, 2, 3, 1)).reshape(C1, 9 * Cin)
    w2f = jnp.transpose(w2_oihw, (0, 2, 3, 1)).reshape(C1, 9 * C1)
    b1c = b1.reshape(C1, 1)
    b2c = b2.reshape(C1, 1)

    kernel = functools.partial(_basic_block_kernel, W=W, L1=L1)
    vmem = pltpu.MemorySpace.VMEM
    out_flat = pl.pallas_call(
        kernel,
        out_shape=jax.ShapeDtypeStruct((N, C1, L2), x_nchw.dtype),
        in_specs=[pl.BlockSpec(memory_space=vmem)] * 5,
        out_specs=pl.BlockSpec(memory_space=vmem),
        scratch_shapes=[
            pltpu.VMEM((9 * Cin, N * L1), jnp.float32),   # im2col for conv1
            pltpu.VMEM((9 * C1, N * L2), jnp.float32),    # im2col for conv2
        ],
    )(x_flat, w1f, b1c, w2f, b2c)

    # Crop the W-strided flat grid back to dense NCHW (free reshape + slice).
    return out_flat.reshape(N, C1, H2, W)[:, :, :, :W2]


def _reference(x_nchw, w1_oihw, b1, w2_oihw, b2):
    """Pure-JAX reference using lax.conv (NCHW/OIHW), for correctness check."""
    def conv(x, w, b):
        y = jax.lax.conv_general_dilated(
            x, w, window_strides=(1, 1), padding="VALID",
            dimension_numbers=("NCHW", "OIHW", "NCHW"))
        return jnp.maximum(y + b[None, :, None, None], 0.0)
    return conv(conv(x_nchw, w1_oihw, b1), w2_oihw, b2)


if __name__ == "__main__":
    # Small shapes consistent with the module: batch=2, in_planes=4, planes=8, 16x16.
    N, in_planes, planes, H, W = 2, 4, 8, 16, 16

    key = jax.random.PRNGKey(0)
    kx, kw1, kb1, kw2, kb2 = jax.random.split(key, 5)
    x = jax.random.normal(kx, (N, in_planes, H, W), dtype=jnp.float32)
    # PyTorch Conv2d parameter shapes: OIHW + bias.
    w1 = jax.random.normal(kw1, (planes, in_planes, 3, 3), dtype=jnp.float32) * 0.1
    b1 = jax.random.normal(kb1, (planes,), dtype=jnp.float32) * 0.1
    w2 = jax.random.normal(kw2, (planes, planes, 3, 3), dtype=jnp.float32) * 0.1
    b2 = jax.random.normal(kb2, (planes,), dtype=jnp.float32) * 0.1

    out = basic_block(x, w1, b1, w2, b2)
    jax.block_until_ready(out)

    ref = _reference(x, w1, b1, w2, b2)
    assert out.shape == (N, planes, H - 4, W - 4), out.shape
    assert jnp.allclose(out, ref, atol=1e-4, rtol=1e-4), "mismatch vs reference"

    print("KERNEL_OK")
</pallas_src>

<mosaic_0001>
module attributes {stable_mosaic.version = 11 : i64} {
  func.func @_basic_block_kernel(%arg0: memref<2x4x260xf32, #tpu.memory_space<vmem>>, %arg1: memref<8x36xf32, #tpu.memory_space<vmem>>, %arg2: memref<8x1xf32, #tpu.memory_space<vmem>>, %arg3: memref<8x72xf32, #tpu.memory_space<vmem>>, %arg4: memref<8x1xf32, #tpu.memory_space<vmem>>, %arg5: memref<2x8x192xf32, #tpu.memory_space<vmem>>, %arg6: memref<36x452xf32, #tpu.memory_space<vmem>>, %arg7: memref<72x384xf32, #tpu.memory_space<vmem>>) attributes {dimension_semantics = [], scalar_prefetch = 0 : i64, scratch_operands = 2 : i64, tpu.core_type = #tpu.core_type<tc>} {
    %c0 = arith.constant 0 : index
    %c0_0 = arith.constant 0 : index
    %c0_1 = arith.constant 0 : index
    %0 = vector.load %arg0[%c0, %c0_0, %c0_1] : memref<2x4x260xf32, #tpu.memory_space<vmem>>, vector<1x4x260xf32>
    %1 = vector.shape_cast %0 : vector<1x4x260xf32> to vector<4x260xf32>
    %2 = vector.extract_strided_slice %1 {offsets = [0, 0], sizes = [4, 226], strides = [1, 1]} : vector<4x260xf32> to vector<4x226xf32>
    %c0_2 = arith.constant 0 : index
    %c0_3 = arith.constant 0 : index
    %3 = vector.load %arg6[%c0_2, %c0_3] : memref<36x452xf32, #tpu.memory_space<vmem>>, vector<4x226xf32>
    tpu.vector_store %arg6[%c0_2, %c0_3], %2 {strides = array<i32>} : memref<36x452xf32, #tpu.memory_space<vmem>>, vector<4x226xf32>,
    %4 = vector.extract_strided_slice %1 {offsets = [0, 1], sizes = [4, 226], strides = [1, 1]} : vector<4x260xf32> to vector<4x226xf32>
    %c4 = arith.constant 4 : index
    %c0_4 = arith.constant 0 : index
    %5 = vector.load %arg6[%c4, %c0_4] : memref<36x452xf32, #tpu.memory_space<vmem>>, vector<4x226xf32>
    tpu.vector_store %arg6[%c4, %c0_4], %4 {strides = array<i32>} : memref<36x452xf32, #tpu.memory_space<vmem>>, vector<4x226xf32>,
    %6 = vector.extract_strided_slice %1 {offsets = [0, 2], sizes = [4, 226], strides = [1, 1]} : vector<4x260xf32> to vector<4x226xf32>
    %c8 = arith.constant 8 : index
    %c0_5 = arith.constant 0 : index
    %7 = vector.load %arg6[%c8, %c0_5] : memref<36x452xf32, #tpu.memory_space<vmem>>, vector<4x226xf32>
    tpu.vector_store %arg6[%c8, %c0_5], %6 {strides = array<i32>} : memref<36x452xf32, #tpu.memory_space<vmem>>, vector<4x226xf32>,
    %8 = vector.extract_strided_slice %1 {offsets = [0, 16], sizes = [4, 226], strides = [1, 1]} : vector<4x260xf32> to vector<4x226xf32>
    %c12 = arith.constant 12 : index
    %c0_6 = arith.constant 0 : index
    %9 = vector.load %arg6[%c12, %c0_6] : memref<36x452xf32, #tpu.memory_space<vmem>>, vector<4x226xf32>
    tpu.vector_store %arg6[%c12, %c0_6], %8 {strides = array<i32>} : memref<36x452xf32, #tpu.memory_space<vmem>>, vector<4x226xf32>,
    %10 = vector.extract_strided_slice %1 {offsets = [0, 17], sizes = [4, 226], strides = [1, 1]} : vector<4x260xf32> to vector<4x226xf32>
    %c16 = arith.constant 16 : index
    %c0_7 = arith.constant 0 : index
    %11 = vector.load %arg6[%c16, %c0_7] : memref<36x452xf32, #tpu.memory_space<vmem>>, vector<4x226xf32>
    tpu.vector_store %arg6[%c16, %c0_7], %10 {strides = array<i32>} : memref<36x452xf32, #tpu.memory_space<vmem>>, vector<4x226xf32>,
    %12 = vector.extract_strided_slice %1 {offsets = [0, 18], sizes = [4, 226], strides = [1, 1]} : vector<4x260xf32> to vector<4x226xf32>
    %c20 = arith.constant 20 : index
    %c0_8 = arith.constant 0 : index
    %13 = vector.load %arg6[%c20, %c0_8] : memref<36x452xf32, #tpu.memory_space<vmem>>, vector<4x226xf32>
    tpu.vector_store %arg6[%c20, %c0_8], %12 {strides = array<i32>} : memref<36x452xf32, #tpu.memory_space<vmem>>, vector<4x226xf32>,
    %14 = vector.extract_strided_slice %1 {offsets = [0, 32], sizes = [4, 226], strides = [1, 1]} : vector<4x260xf32> to vector<4x226xf32>
    %c24 = arith.constant 24 : index
    %c0_9 = arith.constant 0 : index
    %15 = vector.load %arg6[%c24, %c0_9] : memref<36x452xf32, #tpu.memory_space<vmem>>, vector<4x226xf32>
    tpu.vector_store %arg6[%c24, %c0_9], %14 {strides = array<i32>} : memref<36x452xf32, #tpu.memory_space<vmem>>, vector<4x226xf32>,
    %16 = vector.extract_strided_slice %1 {offsets = [0, 33], sizes = [4, 226], strides = [1, 1]} : vector<4x260xf32> to vector<4x226xf32>
    %c28 = arith.constant 28 : index
    %c0_10 = arith.constant 0 : index
    %17 = vector.load %arg6[%c28, %c0_10] : memref<36x452xf32, #tpu.memory_space<vmem>>, vector<4x226xf32>
    tpu.vector_store %arg6[%c28, %c0_10], %16 {strides = array<i32>} : memref<36x452xf32, #tpu.memory_space<vmem>>, vector<4x226xf32>,
    %18 = vector.extract_strided_slice %1 {offsets = [0, 34], sizes = [4, 226], strides = [1, 1]} : vector<4x260xf32> to vector<4x226xf32>
    %c32 = arith.constant 32 : index
    %c0_11 = arith.constant 0 : index
    %19 = vector.load %arg6[%c32, %c0_11] : memref<36x452xf32, #tpu.memory_space<vmem>>, vector<4x226xf32>
    tpu.vector_store %arg6[%c32, %c0_11], %18 {strides = array<i32>} : memref<36x452xf32, #tpu.memory_space<vmem>>, vector<4x226xf32>,
    %c1 = arith.constant 1 : index
    %c0_12 = arith.constant 0 : index
    %c0_13 = arith.constant 0 : index
    %20 = vector.load %arg0[%c1, %c0_12, %c0_13] : memref<2x4x260xf32, #tpu.memory_space<vmem>>, vector<1x4x260xf32>
    %21 = vector.shape_cast %20 : vector<1x4x260xf32> to vector<4x260xf32>
    %22 = vector.extract_strided_slice %21 {offsets = [0, 0], sizes = [4, 226], strides = [1, 1]} : vector<4x260xf32> to vector<4x226xf32>
    %c0_14 = arith.constant 0 : index
    %c226 = arith.constant 226 : index
    %23 = vector.load %arg6[%c0_14, %c226] : memref<36x452xf32, #tpu.memory_space<vmem>>, vector<4x226xf32>
    tpu.vector_store %arg6[%c0_14, %c226], %22 {strides = array<i32>} : memref<36x452xf32, #tpu.memory_space<vmem>>, vector<4x226xf32>,
    %24 = vector.extract_strided_slice %21 {offsets = [0, 1], sizes = [4, 226], strides = [1, 1]} : vector<4x260xf32> to vector<4x226xf32>
    %c4_15 = arith.constant 4 : index
    %c226_16 = arith.constant 226 : index
    %25 = vector.load %arg6[%c4_15, %c226_16] : memref<36x452xf32, #tpu.memory_space<vmem>>, vector<4x226xf32>
    tpu.vector_store %arg6[%c4_15, %c226_16], %24 {strides = array<i32>} : memref<36x452xf32, #tpu.memory_space<vmem>>, vector<4x226xf32>,
    %26 = vector.extract_strided_slice %21 {offsets = [0, 2], sizes = [4, 226], strides = [1, 1]} : vector<4x260xf32> to vector<4x226xf32>
    %c8_17 = arith.constant 8 : index
    %c226_18 = arith.constant 226 : index
    %27 = vector.load %arg6[%c8_17, %c226_18] : memref<36x452xf32, #tpu.memory_space<vmem>>, vector<4x226xf32>
    tpu.vector_store %arg6[%c8_17, %c226_18], %26 {strides = array<i32>} : memref<36x452xf32, #tpu.memory_space<vmem>>, vector<4x226xf32>,
    %28 = vector.extract_strided_slice %21 {offsets = [0, 16], sizes = [4, 226], strides = [1, 1]} : vector<4x260xf32> to vector<4x226xf32>
    %c12_19 = arith.constant 12 : index
    %c226_20 = arith.constant 226 : index
    %29 = vector.load %arg6[%c12_19, %c226_20] : memref<36x452xf32, #tpu.memory_space<vmem>>, vector<4x226xf32>
    tpu.vector_store %arg6[%c12_19, %c226_20], %28 {strides = array<i32>} : memref<36x452xf32, #tpu.memory_space<vmem>>, vector<4x226xf32>,
    %30 = vector.extract_strided_slice %21 {offsets = [0, 17], sizes = [4, 226], strides = [1, 1]} : vector<4x260xf32> to vector<4x226xf32>
    %c16_21 = arith.constant 16 : index
    %c226_22 = arith.constant 226 : index
    %31 = vector.load %arg6[%c16_21, %c226_22] : memref<36x452xf32, #tpu.memory_space<vmem>>, vector<4x226xf32>
    tpu.vector_store %arg6[%c16_21, %c226_22], %30 {strides = array<i32>} : memref<36x452xf32, #tpu.memory_space<vmem>>, vector<4x226xf32>,
    %32 = vector.extract_strided_slice %21 {offsets = [0, 18], sizes = [4, 226], strides = [1, 1]} : vector<4x260xf32> to vector<4x226xf32>
    %c20_23 = arith.constant 20 : index
    %c226_24 = arith.constant 226 : index
    %33 = vector.load %arg6[%c20_23, %c226_24] : memref<36x452xf32, #tpu.memory_space<vmem>>, vector<4x226xf32>
    tpu.vector_store %arg6[%c20_23, %c226_24], %32 {strides = array<i32>} : memref<36x452xf32, #tpu.memory_space<vmem>>, vector<4x226xf32>,
    %34 = vector.extract_strided_slice %21 {offsets = [0, 32], sizes = [4, 226], strides = [1, 1]} : vector<4x260xf32> to vector<4x226xf32>
    %c24_25 = arith.constant 24 : index
    %c226_26 = arith.constant 226 : index
    %35 = vector.load %arg6[%c24_25, %c226_26] : memref<36x452xf32, #tpu.memory_space<vmem>>, vector<4x226xf32>
    tpu.vector_store %arg6[%c24_25, %c226_26], %34 {strides = array<i32>} : memref<36x452xf32, #tpu.memory_space<vmem>>, vector<4x226xf32>,
    %36 = vector.extract_strided_slice %21 {offsets = [0, 33], sizes = [4, 226], strides = [1, 1]} : vector<4x260xf32> to vector<4x226xf32>
    %c28_27 = arith.constant 28 : index
    %c226_28 = arith.constant 226 : index
    %37 = vector.load %arg6[%c28_27, %c226_28] : memref<36x452xf32, #tpu.memory_space<vmem>>, vector<4x226xf32>
    tpu.vector_store %arg6[%c28_27, %c226_28], %36 {strides = array<i32>} : memref<36x452xf32, #tpu.memory_space<vmem>>, vector<4x226xf32>,
    %38 = vector.extract_strided_slice %21 {offsets = [0, 34], sizes = [4, 226], strides = [1, 1]} : vector<4x260xf32> to vector<4x226xf32>
    %c32_29 = arith.constant 32 : index
    %c226_30 = arith.constant 226 : index
    %39 = vector.load %arg6[%c32_29, %c226_30] : memref<36x452xf32, #tpu.memory_space<vmem>>, vector<4x226xf32>
    tpu.vector_store %arg6[%c32_29, %c226_30], %38 {strides = array<i32>} : memref<36x452xf32, #tpu.memory_space<vmem>>, vector<4x226xf32>,
    %c0_31 = arith.constant 0 : index
    %c0_32 = arith.constant 0 : index
    %40 = vector.load %arg1[%c0_31, %c0_32] : memref<8x36xf32, #tpu.memory_space<vmem>>, vector<8x36xf32>
    %c0_33 = arith.constant 0 : index
    %c0_34 = arith.constant 0 : index
    %41 = vector.load %arg6[%c0_33, %c0_34] : memref<36x452xf32, #tpu.memory_space<vmem>>, vector<36x452xf32>
    %cst = arith.constant dense<0.000000e+00> : vector<8x452xf32>
    %42 = tpu.matmul %40, %41, %cst {dimension_numbers = #tpu.dot_dimension_numbers<[1], [0], [0], [1], [0, 0, 1, 1], [], []>} : vector<8x36xf32>, vector<36x452xf32>, vector<8x452xf32> -> vector<8x452xf32>
    %c0_35 = arith.constant 0 : index
    %c0_36 = arith.constant 0 : index
    %43 = vector.load %arg2[%c0_35, %c0_36] : memref<8x1xf32, #tpu.memory_space<vmem>>, vector<8x1xf32>
    %44 = vector.broadcast %43 : vector<8x1xf32> to vector<8x452xf32>
    %45 = arith.addf %42, %44 : vector<8x452xf32>
    %cst_37 = arith.constant 0.000000e+00 : f32
    %46 = vector.broadcast %cst_37 : f32 to vector<8x452xf32>
    %47 = arith.maximumf %45, %46 : vector<8x452xf32>
    %48 = vector.extract_strided_slice %47 {offsets = [0, 0], sizes = [8, 192], strides = [1, 1]} : vector<8x452xf32> to vector<8x192xf32>
    %c0_38 = arith.constant 0 : index
    %c0_39 = arith.constant 0 : index
    %49 = vector.load %arg7[%c0_38, %c0_39] : memref<72x384xf32, #tpu.memory_space<vmem>>, vector<8x192xf32>
    tpu.vector_store %arg7[%c0_38, %c0_39], %48 {strides = array<i32>} : memref<72x384xf32, #tpu.memory_space<vmem>>, vector<8x192xf32>,
    %50 = vector.extract_strided_slice %47 {offsets = [0, 1], sizes = [8, 192], strides = [1, 1]} : vector<8x452xf32> to vector<8x192xf32>
    %c8_40 = arith.constant 8 : index
    %c0_41 = arith.constant 0 : index
    %51 = vector.load %arg7[%c8_40, %c0_41] : memref<72x384xf32, #tpu.memory_space<vmem>>, vector<8x192xf32>
    tpu.vector_store %arg7[%c8_40, %c0_41], %50 {strides = array<i32>} : memref<72x384xf32, #tpu.memory_space<vmem>>, vector<8x192xf32>,
    %52 = vector.extract_strided_slice %47 {offsets = [0, 2], sizes = [8, 192], strides = [1, 1]} : vector<8x452xf32> to vector<8x192xf32>
    %c16_42 = arith.constant 16 : index
    %c0_43 = arith.constant 0 : index
    %53 = vector.load %arg7[%c16_42, %c0_43] : memref<72x384xf32, #tpu.memory_space<vmem>>, vector<8x192xf32>
    tpu.vector_store %arg7[%c16_42, %c0_43], %52 {strides = array<i32>} : memref<72x384xf32, #tpu.memory_space<vmem>>, vector<8x192xf32>,
    %54 = vector.extract_strided_slice %47 {offsets = [0, 16], sizes = [8, 192], strides = [1, 1]} : vector<8x452xf32> to vector<8x192xf32>
    %c24_44 = arith.constant 24 : index
    %c0_45 = arith.constant 0 : index
    %55 = vector.load %arg7[%c24_44, %c0_45] : memref<72x384xf32, #tpu.memory_space<vmem>>, vector<8x192xf32>
    tpu.vector_store %arg7[%c24_44, %c0_45], %54 {strides = array<i32>} : memref<72x384xf32, #tpu.memory_space<vmem>>, vector<8x192xf32>,
    %56 = vector.extract_strided_slice %47 {offsets = [0, 17], sizes = [8, 192], strides = [1, 1]} : vector<8x452xf32> to vector<8x192xf32>
    %c32_46 = arith.constant 32 : index
    %c0_47 = arith.constant 0 : index
    %57 = vector.load %arg7[%c32_46, %c0_47] : memref<72x384xf32, #tpu.memory_space<vmem>>, vector<8x192xf32>
    tpu.vector_store %arg7[%c32_46, %c0_47], %56 {strides = array<i32>} : memref<72x384xf32, #tpu.memory_space<vmem>>, vector<8x192xf32>,
    %58 = vector.extract_strided_slice %47 {offsets = [0, 18], sizes = [8, 192], strides = [1, 1]} : vector<8x452xf32> to vector<8x192xf32>
    %c40 = arith.constant 40 : index
    %c0_48 = arith.constant 0 : index
    %59 = vector.load %arg7[%c40, %c0_48] : memref<72x384xf32, #tpu.memory_space<vmem>>, vector<8x192xf32>
    tpu.vector_store %arg7[%c40, %c0_48], %58 {strides = array<i32>} : memref<72x384xf32, #tpu.memory_space<vmem>>, vector<8x192xf32>,
    %60 = vector.extract_strided_slice %47 {offsets = [0, 32], sizes = [8, 192], strides = [1, 1]} : vector<8x452xf32> to vector<8x192xf32>
    %c48 = arith.constant 48 : index
    %c0_49 = arith.constant 0 : index
    %61 = vector.load %arg7[%c48, %c0_49] : memref<72x384xf32, #tpu.memory_space<vmem>>, vector<8x192xf32>
    tpu.vector_store %arg7[%c48, %c0_49], %60 {strides = array<i32>} : memref<72x384xf32, #tpu.memory_space<vmem>>, vector<8x192xf32>,
    %62 = vector.extract_strided_slice %47 {offsets = [0, 33], sizes = [8, 192], strides = [1, 1]} : vector<8x452xf32> to vector<8x192xf32>
    %c56 = arith.constant 56 : index
    %c0_50 = arith.constant 0 : index
    %63 = vector.load %arg7[%c56, %c0_50] : memref<72x384xf32, #tpu.memory_space<vmem>>, vector<8x192xf32>
    tpu.vector_store %arg7[%c56, %c0_50], %62 {strides = array<i32>} : memref<72x384xf32, #tpu.memory_space<vmem>>, vector<8x192xf32>,
    %64 = vector.extract_strided_slice %47 {offsets = [0, 34], sizes = [8, 192], strides = [1, 1]} : vector<8x452xf32> to vector<8x192xf32>
    %c64 = arith.constant 64 : index
    %c0_51 = arith.constant 0 : index
    %65 = vector.load %arg7[%c64, %c0_51] : memref<72x384xf32, #tpu.memory_space<vmem>>, vector<8x192xf32>
    tpu.vector_store %arg7[%c64, %c0_51], %64 {strides = array<i32>} : memref<72x384xf32, #tpu.memory_space<vmem>>, vector<8x192xf32>,
    %66 = vector.extract_strided_slice %47 {offsets = [0, 226], sizes = [8, 192], strides = [1, 1]} : vector<8x452xf32> to vector<8x192xf32>
    %c0_52 = arith.constant 0 : index
    %c192 = arith.constant 192 : index
    %67 = vector.load %arg7[%c0_52, %c192] : memref<72x384xf32, #tpu.memory_space<vmem>>, vector<8x192xf32>
    tpu.vector_store %arg7[%c0_52, %c192], %66 {strides = array<i32>} : memref<72x384xf32, #tpu.memory_space<vmem>>, vector<8x192xf32>,
    %68 = vector.extract_strided_slice %47 {offsets = [0, 227], sizes = [8, 192], strides = [1, 1]} : vector<8x452xf32> to vector<8x192xf32>
    %c8_53 = arith.constant 8 : index
    %c192_54 = arith.constant 192 : index
    %69 = vector.load %arg7[%c8_53, %c192_54] : memref<72x384xf32, #tpu.memory_space<vmem>>, vector<8x192xf32>
    tpu.vector_store %arg7[%c8_53, %c192_54], %68 {strides = array<i32>} : memref<72x384xf32, #tpu.memory_space<vmem>>, vector<8x192xf32>,
    %70 = vector.extract_strided_slice %47 {offsets = [0, 228], sizes = [8, 192], strides = [1, 1]} : vector<8x452xf32> to vector<8x192xf32>
    %c16_55 = arith.constant 16 : index
    %c192_56 = arith.constant 192 : index
    %71 = vector.load %arg7[%c16_55, %c192_56] : memref<72x384xf32, #tpu.memory_space<vmem>>, vector<8x192xf32>
    tpu.vector_store %arg7[%c16_55, %c192_56], %70 {strides = array<i32>} : memref<72x384xf32, #tpu.memory_space<vmem>>, vector<8x192xf32>,
    %72 = vector.extract_strided_slice %47 {offsets = [0, 242], sizes = [8, 192], strides = [1, 1]} : vector<8x452xf32> to vector<8x192xf32>
    %c24_57 = arith.constant 24 : index
    %c192_58 = arith.constant 192 : index
    %73 = vector.load %arg7[%c24_57, %c192_58] : memref<72x384xf32, #tpu.memory_space<vmem>>, vector<8x192xf32>
    tpu.vector_store %arg7[%c24_57, %c192_58], %72 {strides = array<i32>} : memref<72x384xf32, #tpu.memory_space<vmem>>, vector<8x192xf32>,
    %74 = vector.extract_strided_slice %47 {offsets = [0, 243], sizes = [8, 192], strides = [1, 1]} : vector<8x452xf32> to vector<8x192xf32>
    %c32_59 = arith.constant 32 : index
    %c192_60 = arith.constant 192 : index
    %75 = vector.load %arg7[%c32_59, %c192_60] : memref<72x384xf32, #tpu.memory_space<vmem>>, vector<8x192xf32>
    tpu.vector_store %arg7[%c32_59, %c192_60], %74 {strides = array<i32>} : memref<72x384xf32, #tpu.memory_space<vmem>>, vector<8x192xf32>,
    %76 = vector.extract_strided_slice %47 {offsets = [0, 244], sizes = [8, 192], strides = [1, 1]} : vector<8x452xf32> to vector<8x192xf32>
    %c40_61 = arith.constant 40 : index
    %c192_62 = arith.constant 192 : index
    %77 = vector.load %arg7[%c40_61, %c192_62] : memref<72x384xf32, #tpu.memory_space<vmem>>, vector<8x192xf32>
    tpu.vector_store %arg7[%c40_61, %c192_62], %76 {strides = array<i32>} : memref<72x384xf32, #tpu.memory_space<vmem>>, vector<8x192xf32>,
    %78 = vector.extract_strided_slice %47 {offsets = [0, 258], sizes = [8, 192], strides = [1, 1]} : vector<8x452xf32> to vector<8x192xf32>
    %c48_63 = arith.constant 48 : index
    %c192_64 = arith.constant 192 : index
    %79 = vector.load %arg7[%c48_63, %c192_64] : memref<72x384xf32, #tpu.memory_space<vmem>>, vector<8x192xf32>
    tpu.vector_store %arg7[%c48_63, %c192_64], %78 {strides = array<i32>} : memref<72x384xf32, #tpu.memory_space<vmem>>, vector<8x192xf32>,
    %80 = vector.extract_strided_slice %47 {offsets = [0, 259], sizes = [8, 192], strides = [1, 1]} : vector<8x452xf32> to vector<8x192xf32>
    %c56_65 = arith.constant 56 : index
    %c192_66 = arith.constant 192 : index
    %81 = vector.load %arg7[%c56_65, %c192_66] : memref<72x384xf32, #tpu.memory_space<vmem>>, vector<8x192xf32>
    tpu.vector_store %arg7[%c56_65, %c192_66], %80 {strides = array<i32>} : memref<72x384xf32, #tpu.memory_space<vmem>>, vector<8x192xf32>,
    %82 = vector.extract_strided_slice %47 {offsets = [0, 260], sizes = [8, 192], strides = [1, 1]} : vector<8x452xf32> to vector<8x192xf32>
    %c64_67 = arith.constant 64 : index
    %c192_68 = arith.constant 192 : index
    %83 = vector.load %arg7[%c64_67, %c192_68] : memref<72x384xf32, #tpu.memory_space<vmem>>, vector<8x192xf32>
    tpu.vector_store %arg7[%c64_67, %c192_68], %82 {strides = array<i32>} : memref<72x384xf32, #tpu.memory_space<vmem>>, vector<8x192xf32>,
    %c0_69 = arith.constant 0 : index
    %c0_70 = arith.constant 0 : index
    %84 = vector.load %arg3[%c0_69, %c0_70] : memref<8x72xf32, #tpu.memory_space<vmem>>, vector<8x72xf32>
    %c0_71 = arith.constant 0 : index
    %c0_72 = arith.constant 0 : index
    %85 = vector.load %arg7[%c0_71, %c0_72] : memref<72x384xf32, #tpu.memory_space<vmem>>, vector<72x384xf32>
    %cst_73 = arith.constant dense<0.000000e+00> : vector<8x384xf32>
    %86 = tpu.matmul %84, %85, %cst_73 {dimension_numbers = #tpu.dot_dimension_numbers<[1], [0], [0], [1], [0, 0, 1, 1], [], []>} : vector<8x72xf32>, vector<72x384xf32>, vector<8x384xf32> -> vector<8x384xf32>
    %c0_74 = arith.constant 0 : index
    %c0_75 = arith.constant 0 : index
    %87 = vector.load %arg4[%c0_74, %c0_75] : memref<8x1xf32, #tpu.memory_space<vmem>>, vector<8x1xf32>
    %88 = vector.broadcast %87 : vector<8x1xf32> to vector<8x384xf32>
    %89 = arith.addf %86, %88 : vector<8x384xf32>
    %cst_76 = arith.constant 0.000000e+00 : f32
    %90 = vector.broadcast %cst_76 : f32 to vector<8x384xf32>
    %91 = arith.maximumf %89, %90 : vector<8x384xf32>
    %92 = vector.extract_strided_slice %91 {offsets = [0, 0], sizes = [8, 192], strides = [1, 1]} : vector<8x384xf32> to vector<8x192xf32>
    %c0_77 = arith.constant 0 : index
    %c0_78 = arith.constant 0 : index
    %c0_79 = arith.constant 0 : index
    %93 = vector.load %arg5[%c0_77, %c0_78, %c0_79] : memref<2x8x192xf32, #tpu.memory_space<vmem>>, vector<1x8x192xf32>
    %94 = vector.shape_cast %93 : vector<1x8x192xf32> to vector<8x192xf32>
    %95 = vector.shape_cast %92 : vector<8x192xf32> to vector<1x8x192xf32>
    tpu.vector_store %arg5[%c0_77, %c0_78, %c0_79], %95 {strides = array<i32>} : memref<2x8x192xf32, #tpu.memory_space<vmem>>, vector<1x8x192xf32>,
    %96 = vector.extract_strided_slice %91 {offsets = [0, 192], sizes = [8, 192], strides = [1, 1]} : vector<8x384xf32> to vector<8x192xf32>
    %c1_80 = arith.constant 1 : index
    %c0_81 = arith.constant 0 : index
    %c0_82 = arith.constant 0 : index
    %97 = vector.load %arg5[%c1_80, %c0_81, %c0_82] : memref<2x8x192xf32, #tpu.memory_space<vmem>>, vector<1x8x192xf32>
    %98 = vector.shape_cast %97 : vector<1x8x192xf32> to vector<8x192xf32>
    %99 = vector.shape_cast %96 : vector<8x192xf32> to vector<1x8x192xf32>
    tpu.vector_store %arg5[%c1_80, %c0_81, %c0_82], %99 {strides = array<i32>} : memref<2x8x192xf32, #tpu.memory_space<vmem>>, vector<1x8x192xf32>,
    return
  }
}

</mosaic_0001>

<bundles_post_ra>
// kernel: basic_block.1
= control target key start
LH: loop header
LB: loop body
LE: loop exit
PB: predicated region body
PF: predicated region fallthrough
CT: control target
= control target key end

     0   :  { %s901_s22 = smov 96   ;;  %s902_s23 = smov 94   ;;  %vm26_vm0 = vcmask 797696   ;;  %v917_v10 = vmov 0.0   ;;  %v918_v11 = vmov 0   ;;  %vm87_vm1 = vcmask 785408   ;;  %s1195_s0 = inlined_call_operand.vmem [shape: f32[2,4,260], index: 0, kind: input, shape index: {}]   ;;  %s1196_s2 = inlined_call_operand.vmem [shape: f32[8,1], index: 2, kind: input, shape index: {}]   ;;  %s1197_s1 = inlined_call_operand.vmem [shape: f32[8,36], index: 1, kind: input, shape index: {}]   ;;  %s1198_s4 = inlined_call_operand.vmem [shape: f32[8,1], index: 4, kind: input, shape index: {}]   ;;  %s1199_s3 = inlined_call_operand.vmem [shape: f32[8,72], index: 3, kind: input, shape index: {}]   ;;  %s1200_s5 = inlined_call_operand.vmem [shape: f32[2,8,192], index: 5, kind: output, shape index: {}]  }
   0x1   :  { %v21_v0 = vld [vmem:[%s1195_s0 + $0x8] sm:$0xf]  ;;  %v20_v1 = vld [vmem:[%s1195_s0] sm:$0xff]  ;;  %s903_s24 = smov 95   ;;  %v823_v4 = vld [vmem:[%s1195_s0 + $0xc] sm:$0xff]  ;;  %s904_s27 = smov 64   ;;  %357 = vmatprep.mubr.f32.mxu0 %v917_v10  ;;  %428 = vmatprep.mubr.f32.mxu1 %v917_v10 }
   0x2   :  { %85 = vrot.lane.b32.xlu1 %v21_v0, %s901_s22  ;;  %25 = vst [vmem:[#allocation2] sm:$0xf] %v20_v1  ;;  %112 = vrot.lane.b32.xlu0 %v21_v0, %s902_s23  ;;  %v23_v2 = vcombine.high %v20_v1, %v20_v1  ;;  %v94_v3 = vcombine.low %v21_v0, %v21_v0  ;;  %s905_s28 = smov 65   ;;  %s906_s29 = smov 66   ;;  %v824_v8 = vld [vmem:[%s1195_s0 + $0x14] sm:$0xf] }
   0x3   :  { %v28_v5 = vcombine.low %v20_v1, %v20_v1  ;;  %v140_v6 = vcombine.low %v823_v4, %v823_v4  ;;  %v125_v7 = vcombine.high %v823_v4, %v823_v4  ;;  %s907_s7 = smov 110   ;;  %s908_s8 = smov 111   ;;  %v218_v9 = vcombine.low %v824_v8, %v824_v8  ;;  %893 = vset.pattern.permute.xlu0 %v918_v11  ;;  %v270_v12 = vld [vmem:[%s1196_s2] sm:$0xff] }
   0x4   :  { %27 = vst.msk [vmem:[#allocation2 + $0x8] sm:$0xf] %vm26_vm0, %v23_v2  ;;  %s909_s9 = smov 80   ;;  %s910_s10 = smov 81   ;;  %894 = vset.pattern.permute.xlu1 %v918_v11  ;;  %vm114_vm2 = vcmask 769024   ;;  %vm101_vm3 = vcmask 777216  }
   0x5   :  { %s911_s0 = smov 112   ;;  %s912_s11 = smov 126   ;;  %vm38_vm4 = vcmask 801796   ;;  %vm135_vm5 = vcmask 1044240   ;;  %vm150_vm6 = vcmask 1048340   ;;  %vm280_vm7 = vcmask 1043456  }
   0x6   :  { %83 = vrot.lane.b32.xlu1 %v23_v2, %s901_s22  ;;  %110 = vrot.lane.b32.xlu0 %v23_v2, %s902_s23  ;;  %s913_s12 = smov 82   ;;  %s914_s13 = smov 127   ;;  %vm240_vm8 = vcmask 523264   ;;  %vm138_vm9 = vcmask 551936   ;;  %vm74_vm10 = vcmask 900096   ;;  %vm64_vm11 = vcmask 908288  }
   0x7   :  { %s915_s14 = smov 97   ;;  %s916_s15 = smov 98   ;;  %vm209_vm12 = vcmask 539648   ;;  %vm225_vm13 = vcmask 531456   ;;  %vm153_vm14 = vcmask 556036   ;;  %vm54_vm15 = vcmask 916480  }
   0x8   :  { %s920_s19 = smov 60   ;;  %s921_s20 = smov 62  }
   0x9   :  { %s922_s21 = smov 77   ;;  %s923_s25 = smov 76  }
   0xa   :  { %99 = vrot.lane.b32.xlu1 %v94_v3, %s903_s24  ;;  %97 = vrot.lane.b32.xlu0 %v20_v1, %s903_s24  ;;  %s924_s26 = smov 92  }
   0xe   :  { %234 = vrot.lane.b32.xlu1 %v823_v4, %s904_s27  ;;  %108 = vrot.lane.b32.xlu0 %v20_v1, %s902_s23 }
  0x12   :  { %95 = vrot.lane.b32.xlu1 %v28_v5, %s903_s24  ;;  %81 = vrot.lane.b32.xlu0 %v20_v1, %s901_s22 }
  0x16   :  { %219 = vrot.lane.b32.xlu1 %v140_v6, %s905_s28  ;;  %203 = vrot.lane.b32.xlu0 %v823_v4, %s906_s29 }
  0x1a   :  { %238 = vrot.lane.b32.xlu1 %v824_v8, %s904_s27  ;;  %236 = vrot.lane.b32.xlu0 %v125_v7, %s904_s27 }
  0x1e   :  { %72 = vrot.lane.b32.xlu1 %v20_v1, %s907_s7  ;;  %62 = vrot.lane.b32.xlu0 %v23_v2, %s908_s8 }
  0x22   :  { %70 = vrot.lane.b32.xlu1 %v28_v5, %s907_s7  ;;  %60 = vrot.lane.b32.xlu0 %v20_v1, %s908_s8 }
  0x26   :  { %190 = vrot.lane.b32.xlu1 %v140_v6, %s909_s9  ;;  %178 = vrot.lane.b32.xlu0 %v823_v4, %s910_s10 }
  0x2a   :  { %207 = vrot.lane.b32.xlu1 %v824_v8, %s906_s29  ;;  %205 = vrot.lane.b32.xlu0 %v125_v7, %s906_s29  ;;  %s926_s29 = smov 93  }
  0x2e   :  { %223 = vrot.lane.b32.xlu1 %v218_v9, %s905_s28  ;;  %221 = vrot.lane.b32.xlu0 %v823_v4, %s905_s28  ;;  %s925_s28 = smov 78  }
  0x32   :  { %52 = vrot.lane.b32.xlu1 %v20_v1, %s911_s0  ;;  %42 = vrot.lane.b32.xlu0 %v23_v2, %s912_s11 }
  0x36   :  { %50 = vrot.lane.b32.xlu1 %v28_v5, %s911_s0  ;;  %40 = vrot.lane.b32.xlu0 %v20_v1, %s912_s11 }
  0x3a   :  { %166 = vrot.lane.b32.xlu1 %v140_v6, %s913_s12  ;;  %155 = vrot.lane.b32.xlu0 %v823_v4, %s901_s22 }
  0x3e   :  { %180 = vrot.lane.b32.xlu1 %v125_v7, %s910_s10  ;;  %31 = vrot.lane.b32.xlu0 %v20_v1, %s914_s13 }
  0x42   :  { %29 = vrot.lane.b32.xlu1 %v28_v5, %s914_s13  ;;  %192 = vrot.lane.b32.xlu0 %v823_v4, %s909_s9 }
  0x46   :  { %141 = vrot.lane.b32.xlu1 %v140_v6, %s915_s14  ;;  %126 = vrot.lane.b32.xlu0 %v823_v4, %s916_s15 }
  0x4a   :  { %168 = vrot.lane.b32.xlu1 %v823_v4, %s913_s12  ;;  %157 = vrot.lane.b32.xlu0 %v125_v7, %s901_s22 }
  0x4e   :  { %143 = vrot.lane.b32.xlu1 %v823_v4, %s915_s14  ;;  %128 = vrot.lane.b32.xlu0 %v125_v7, %s916_s15 }
  0x52   :  { %273 = vperm.xlu0 %893, %v270_v12  }
  0x74   :  { %v86_v13 = vpop.permute.xlu1 %85  ;;  %v113_v14 = vpop.permute.xlu0 %112 }
  0x78   :  { %v84_v15 = vpop.permute.xlu1 %83  ;;  %v111_v16 = vpop.permute.xlu0 %110 }
  0x79   :  { %v89_v17 = vsel %vm87_vm1, %v84_v15, %v86_v13  ;;  %v116_v18 = vsel %vm114_vm2, %v111_v16, %v113_v14 }
  0x7a   :  { %93 = vst.msk [vmem:[#allocation2 + $0x68] sm:$0xf] %vm26_vm0, %v89_v17  ;;  %120 = vst.msk [vmem:[#allocation2 + $0x88] sm:$0xf] %vm26_vm0, %v116_v18 }
  0x7c   :  { %v100_v19 = vpop.permute.xlu1 %99  ;;  %v98_v20 = vpop.permute.xlu0 %97 }
  0x7d   :  { %v103_v21 = vsel %vm101_vm3, %v98_v20, %v100_v19 }
  0x7e   :  { %107 = vst.msk [vmem:[#allocation2 + $0x68] sm:$0xf0] %vm38_vm4, %v103_v21 }
  0x80   :  { %v235_v22 = vpop.permute.xlu1 %234  ;;  %v109_v23 = vpop.permute.xlu0 %108 }
  0x81   :  { %246 = vst.msk [vmem:[#allocation2 + $0x88] sm:$0xf] %vm135_vm5, %v235_v22  ;;  %v115_v24 = vsel %vm114_vm2, %v109_v23, %v111_v16 }
  0x82   :  { %119 = vst [vmem:[#allocation2 + $0x80] sm:$0xf] %v115_v24 }
  0x84   :  { %v96_v25 = vpop.permute.xlu1 %95  ;;  %v82_v26 = vpop.permute.xlu0 %81 }
  0x85   :  { %v102_v27 = vsel %vm101_vm3, %v96_v25, %v98_v20  ;;  %v88_v28 = vsel %vm87_vm1, %v82_v26, %v84_v15  ;;  %v249_v26 = vld [vmem:[%s1197_s1] sm:$0xff]  ;;  %s919_s1 = smov 61  }
  0x86   :  { %106 = vst [vmem:[#allocation2 + $0x60] sm:$0xf0] %v102_v27  ;;  %92 = vst [vmem:[#allocation2 + $0x60] sm:$0xf] %v88_v28 }
  0x88   :  { %v220_v29 = vpop.permute.xlu1 %219  ;;  %v204_v30 = vpop.permute.xlu0 %203  ;;  %v267_v31 = vld [vmem:[#allocation2 + $0x88] sm:$0xf] }
  0x89   :  { %231 = vst.msk [vmem:[#allocation2 + $0x68] sm:$0xf0] %vm150_vm6, %v220_v29  ;;  %825 = vmatprep.subr.msk.mxu0 %vm280_vm7, %v267_v31  ;;  %v266_v32 = vld [vmem:[#allocation2 + $0x80] sm:$0xf] }
  0x8a   :  { %215 = vst.msk [vmem:[#allocation2 + $0x68] sm:$0xf] %vm135_vm5, %v204_v30  ;;  %826 = vmatpush1.msk.msra.mxu0 %vm280_vm7, %v266_v32 }
  0x8c   :  { %v239_v33 = vpop.permute.xlu1 %238  ;;  %v237_v34 = vpop.permute.xlu0 %236 }
  0x8d   :  { %v241_v35 = vsel %vm240_vm8, %v235_v22, %v237_v34  ;;  %v242_v36 = vsel %vm240_vm8, %v237_v34, %v239_v33  ;;  %v262_v40 = vld [vmem:[#allocation2 + $0x60] sm:$0xff] }
  0x8e   :  { %247 = vst [vmem:[#allocation2 + $0x90] sm:$0xf] %v241_v35  ;;  %248 = vst.msk [vmem:[#allocation2 + $0x98] sm:$0xf] %vm138_vm9, %v242_v36 }
  0x90   :  { %v73_v37 = vpop.permute.xlu1 %72  ;;  %v63_v38 = vpop.permute.xlu0 %62 }
  0x91   :  { %v263_v39 = vld [vmem:[#allocation2 + $0x68] sm:$0xff]  ;;  %79 = vst.msk [vmem:[#allocation2 + $0x48] sm:$0xf0] %vm38_vm4, %v73_v37 }
  0x92   :  { %69 = vst.msk [vmem:[#allocation2 + $0x48] sm:$0xf] %vm26_vm0, %v63_v38  ;;  %317 = vmatprep.subr.mxu0 %v263_v39 }
  0x93   :  { %318 = vmatpush1.msra.mxu0 %v262_v40 }
  0x94   :  { %v71_v41 = vpop.permute.xlu1 %70  ;;  %v61_v42 = vpop.permute.xlu0 %60 }
  0x95   :  { %v75_v43 = vsel %vm74_vm10, %v71_v41, %v73_v37  ;;  %v65_v44 = vsel %vm64_vm11, %v61_v42, %v63_v38  ;;  %v269_v45 = vld [vmem:[#allocation2 + $0x98] sm:$0xf]  ;;  %v268_v46 = vld [vmem:[#allocation2 + $0x90] sm:$0xf] }
  0x96   :  { %78 = vst [vmem:[#allocation2 + $0x40] sm:$0xf0] %v75_v43  ;;  %68 = vst [vmem:[#allocation2 + $0x40] sm:$0xf] %v65_v44  ;;  %828 = vmatprep.subr.msk.mxu1 %vm280_vm7, %v269_v45 }
  0x97   :  { %829 = vmatpush1.msk.msra.mxu1 %vm280_vm7, %v268_v46  ;;  %vm44_vm7 = vcmask 1031168  }
  0x98   :  { %v191_v47 = vpop.permute.xlu1 %190  ;;  %v179_v48 = vpop.permute.xlu0 %178 }
  0x99   :  { %199 = vst.msk [vmem:[#allocation2 + $0x48] sm:$0xf0] %vm150_vm6, %v191_v47 }
  0x9a   :  { %187 = vst.msk [vmem:[#allocation2 + $0x48] sm:$0xf] %vm135_vm5, %v179_v48 }
  0x9c   :  { %v208_v49 = vpop.permute.xlu1 %207  ;;  %v206_v50 = vpop.permute.xlu0 %205 }
  0x9d   :  { %v210_v51 = vsel %vm209_vm12, %v204_v30, %v206_v50  ;;  %v211_v52 = vsel %vm209_vm12, %v206_v50, %v208_v49  ;;  %v258_v58 = vld [vmem:[#allocation2 + $0x40] sm:$0xff]  ;;  %vm33_vm12 = vcmask 1039360  }
  0x9e   :  { %216 = vst [vmem:[#allocation2 + $0x70] sm:$0xf] %v210_v51  ;;  %217 = vst.msk [vmem:[#allocation2 + $0x78] sm:$0xf] %vm138_vm9, %v211_v52 }
  0xa0   :  { %v224_v53 = vpop.permute.xlu1 %223  ;;  %v222_v54 = vpop.permute.xlu0 %221 }
  0xa1   :  { %v259_v55 = vld [vmem:[#allocation2 + $0x48] sm:$0xff]  ;;  %v226_v56 = vsel %vm225_vm13, %v220_v29, %v222_v54  ;;  %v227_v57 = vsel %vm225_vm13, %v222_v54, %v224_v53  ;;  %vm194_vm13 = vcmask 654336  }
  0xa2   :  { %319 = vmatprep.subr.mxu0 %v259_v55  ;;  %232 = vst [vmem:[#allocation2 + $0x70] sm:$0xf0] %v226_v56  ;;  %233 = vst.msk [vmem:[#allocation2 + $0x78] sm:$0xf0] %vm153_vm14, %v227_v57 }
  0xa3   :  { %320 = vmatpush1.msra.mxu0 %v258_v58 }
  0xa4   :  { %v53_v59 = vpop.permute.xlu1 %52  ;;  %v43_v60 = vpop.permute.xlu0 %42 }
  0xa5   :  { %59 = vst.msk [vmem:[#allocation2 + $0x28] sm:$0xf0] %vm38_vm4, %v53_v59 }
  0xa6   :  { %49 = vst.msk [vmem:[#allocation2 + $0x28] sm:$0xf] %vm26_vm0, %v43_v60  ;;  %vm182_vm0 = vcmask 662528  }
  0xa8   :  { %v51_v61 = vpop.permute.xlu1 %50  ;;  %v41_v62 = vpop.permute.xlu0 %40 }
  0xa9   :  { %v55_v63 = vsel %vm54_vm15, %v51_v61, %v53_v59  ;;  %v45_v0 = vsel %vm44_vm7, %v41_v62, %v43_v60  ;;  %v265_v1 = vld [vmem:[#allocation2 + $0x78] sm:$0xff]  ;;  %v264_v2 = vld [vmem:[#allocation2 + $0x70] sm:$0xff] }
  0xaa   :  { %58 = vst [vmem:[#allocation2 + $0x20] sm:$0xf0] %v55_v63  ;;  %48 = vst [vmem:[#allocation2 + $0x20] sm:$0xf] %v45_v0  ;;  %388 = vmatprep.subr.mxu1 %v265_v1 }
  0xab   :  { %389 = vmatpush1.msra.mxu1 %v264_v2 }
  0xac   :  { %v167_v3 = vpop.permute.xlu1 %166  ;;  %v156_v4 = vpop.permute.xlu0 %155 }
  0xad   :  { %175 = vst.msk [vmem:[#allocation2 + $0x28] sm:$0xf0] %vm150_vm6, %v167_v3 }
  0xae   :  { %163 = vst.msk [vmem:[#allocation2 + $0x28] sm:$0xf] %vm135_vm5, %v156_v4 }
  0xb0   :  { %v181_v5 = vpop.permute.xlu1 %180  ;;  %v32_v6 = vpop.permute.xlu0 %31 }
  0xb1   :  { %v183_v7 = vsel %vm182_vm0, %v179_v48, %v181_v5  ;;  %189 = vst.msk [vmem:[#allocation2 + $0x58] sm:$0xf] %vm138_vm9, %v181_v5  ;;  %v254_v14 = vld [vmem:[#allocation2 + $0x20] sm:$0xff]  ;;  %vm145_vm0 = vcmask 793600  }
  0xb2   :  { %39 = vst.msk [vmem:[#allocation2 + $0x8] sm:$0xf0] %vm38_vm4, %v32_v6  ;;  %188 = vst [vmem:[#allocation2 + $0x50] sm:$0xf] %v183_v7  ;;  %vm170_vm4 = vcmask 670720  }
  0xb4   :  { %v30_v8 = vpop.permute.xlu1 %29  ;;  %v193_v9 = vpop.permute.xlu0 %192 }
  0xb5   :  { %v255_v11 = vld [vmem:[#allocation2 + $0x28] sm:$0xff]  ;;  %v34_v12 = vsel %vm33_vm12, %v30_v8, %v32_v6  ;;  %v195_v13 = vsel %vm194_vm13, %v191_v47, %v193_v9  ;;  %201 = vst.msk [vmem:[#allocation2 + $0x58] sm:$0xf0] %vm153_vm14, %v193_v9  ;;  %v651_v47 = vld [vmem:[%s1198_s4] sm:$0xff]  ;;  %vm597_vm13 = vcmask 506880  }
  0xb6   :  { %321 = vmatprep.subr.mxu0 %v255_v11  ;;  %37 = vst [vmem:[#allocation2] sm:$0xf0] %v34_v12  ;;  %200 = vst [vmem:[#allocation2 + $0x50] sm:$0xf0] %v195_v13 }
  0xb7   :  { %322 = vmatpush1.msra.mxu0 %v254_v14 }
  0xb8   :  { %v142_v15 = vpop.permute.xlu1 %141  ;;  %v127_v16 = vpop.permute.xlu0 %126 }
  0xb9   :  { %151 = vst.msk [vmem:[#allocation2 + $0x8] sm:$0xf0] %vm150_vm6, %v142_v15  ;;  %vm130_vm6 = vcmask 801792  }
  0xba   :  { %136 = vst.msk [vmem:[#allocation2 + $0x8] sm:$0xf] %vm135_vm5, %v127_v16  ;;  %vm276_vm5 = vcmask 293888  }
  0xbc   :  { %v169_v17 = vpop.permute.xlu1 %168  ;;  %v158_v18 = vpop.permute.xlu0 %157  ;;  %v261_v19 = vld [vmem:[#allocation2 + $0x58] sm:$0xff] }
  0xbd   :  { %v171_v20 = vsel %vm170_vm4, %v167_v3, %v169_v17  ;;  %177 = vst.msk [vmem:[#allocation2 + $0x38] sm:$0xf0] %vm153_vm14, %v169_v17  ;;  %v159_v21 = vsel %vm87_vm1, %v156_v4, %v158_v18  ;;  %390 = vmatprep.subr.mxu1 %v261_v19  ;;  %v260_v22 = vld [vmem:[#allocation2 + $0x50] sm:$0xff]  ;;  %v250_v29 = vld [vmem:[#allocation2] sm:$0xff]  ;;  %vm607_vm4 = vcmask 498688  }
  0xbe   :  { %165 = vst.msk [vmem:[#allocation2 + $0x38] sm:$0xf] %vm138_vm9, %v158_v18  ;;  %176 = vst [vmem:[#allocation2 + $0x30] sm:$0xf0] %v171_v20  ;;  %391 = vmatpush1.msra.mxu1 %v260_v22 }
  0xbf   :  { %164 = vst [vmem:[#allocation2 + $0x30] sm:$0xf] %v159_v21 }
  0xc0   :  { %v144_v23 = vpop.permute.xlu1 %143  ;;  %v129_v24 = vpop.permute.xlu0 %128 }
  0xc1   :  { %v251_v25 = vld [vmem:[#allocation2 + $0x8] sm:$0xff]  ;;  %v146_v27 = vsel %vm145_vm0, %v142_v15, %v144_v23  ;;  %154 = vst.msk [vmem:[#allocation2 + $0x18] sm:$0xf0] %vm153_vm14, %v144_v23  ;;  %v131_v28 = vsel %vm130_vm6, %v127_v16, %v129_v24  ;;  %vm617_vm14 = vcmask 490496   ;;  %vm573_vm0 = vcmask 629760  }
  0xc2   :  { %139 = vst.msk [vmem:[#allocation2 + $0x18] sm:$0xf] %vm138_vm9, %v129_v24  ;;  %323 = vmatprep.subr.mxu0 %v251_v25  ;;  %152 = vst [vmem:[#allocation2 + $0x10] sm:$0xf0] %v146_v27  ;;  %vm927_vm9 = vmmov 0   ;;  %vm586_vm6 = vcmask 621568  }
  0xc3   :  { %137 = vst [vmem:[#allocation2 + $0x10] sm:$0xf] %v131_v28  ;;  %324 = vmatpush1.msra.mxu0 %v250_v29 }
  0xc4   :  { %827 = vmatmul.mubr.msk.f32.vlgmr.msra.gmra.mxu0 %vm276_vm5, %v249_v26 }
  0xc5   :  { %v257_v30 = vld [vmem:[#allocation2 + $0x38] sm:$0xff]  ;;  %725 = vmatprep.mubr.f32.mxu0 %v917_v10 }
  0xc6   :  { %392 = vmatprep.subr.mxu1 %v257_v30  ;;  %v256_v31 = vld [vmem:[#allocation2 + $0x30] sm:$0xff] }
  0xc7   :  { %393 = vmatpush1.msra.mxu1 %v256_v31 }
  0xc9   :  { %v253_v32 = vld [vmem:[#allocation2 + $0x18] sm:$0xff] }
  0xca   :  { %394 = vmatprep.subr.mxu1 %v253_v32  ;;  %v252_v33 = vld [vmem:[#allocation2 + $0x10] sm:$0xff] }
  0xcb   :  { %395 = vmatpush1.msra.mxu1 %v252_v33 }
  0xcc   :  { %830 = vmatmul.mubr.msk.f32.vlgmr.msra.gmra.mxu1 %vm276_vm5, %v249_v26  ;;  %845 = vmatprep.subr.mxu1 %v917_v10  ;;  %vm547_vm5 = vcmask 752640  }
  0xcd   :  { %v274_v34 = vpop.permute.xlu0 %273  ;;  %863 = vmatprep.mubr.msk.f32.mxu1 %vm927_vm9, %v917_v10  ;;  %vm560_vm9 = vcmask 637952  }
 0x184   :  { %v359_v35 = vpop.f32.mrf.mxu0 }
 0x185   :  { %v360_v36 = vadd.f32 %v359_v35, %v274_v34 }
 0x186   :  { %v361_v37 = vpop.f32.mrf.mxu0 }
 0x187   :  { %v1051_v38 = vmax.f32 %v360_v36, 0.0  ;;  %v362_v39 = vadd.f32 %v361_v37, %v274_v34 }
 0x189   :  { %v436_v40 = vmax.f32 %v362_v39, 0.0 }
 0x18b   :  { %440 = vst.msk [vmem:[#allocation3 + $0x8] sm:$0xff] %vm240_vm8, %v436_v40 }
 0x18c   :  { %v430_v41 = vpop.f32.mrf.mxu1 }
 0x18d   :  { %v431_v42 = vadd.f32 %v430_v41, %v274_v34 }
 0x18e   :  { %v432_v44 = vpop.f32.mrf.mxu1 }
 0x18f   :  { %v437_v43 = vmax.f32 %v431_v42, 0.0  ;;  %v433_v45 = vadd.f32 %v432_v44, %v274_v34 }
 0x191   :  { %603 = vrot.lane.b32.xlu1 %v437_v43, %s919_s1  ;;  %613 = vrot.lane.b32.xlu0 %v437_v43, %s920_s19  ;;  %v438_v46 = vmax.f32 %v433_v45, 0.0 }
 0x195   :  { %593 = vrot.lane.b32.xlu1 %v437_v43, %s921_s20  ;;  %569 = vrot.lane.b32.xlu0 %v437_v43, %s922_s21 }
 0x199   :  { %582 = vrot.lane.b32.xlu1 %v437_v43, %s923_s25  ;;  %543 = vrot.lane.b32.xlu0 %v437_v43, %s924_s26 }
 0x19d   :  { %556 = vrot.lane.b32.xlu1 %v437_v43, %s925_s28  ;;  %497 = vrot.lane.b32.xlu0 %v1051_v38, %s903_s24 }
 0x1a1   :  { %530 = vrot.lane.b32.xlu1 %v437_v43, %s926_s29  ;;  %488 = vrot.lane.b32.xlu0 %v1051_v38, %s901_s22 }
 0x1a5   :  { %479 = vrot.lane.b32.xlu0 %v1051_v38, %s907_s7  ;;  %506 = vrot.lane.b32.xlu1 %v1051_v38, %s902_s23 }
 0x1a9   :  { %461 = vrot.lane.b32.xlu0 %v1051_v38, %s911_s0  ;;  %470 = vrot.lane.b32.xlu1 %v1051_v38, %s908_s8 }
 0x1ad   :  { %443 = vrot.lane.b32.xlu0 %v1051_v38, %s914_s13  ;;  %452 = vrot.lane.b32.xlu1 %v1051_v38, %s912_s11 }
 0x1b1   :  { %615 = vrot.lane.b32.xlu0 %v438_v46, %s920_s19  ;;  %595 = vrot.lane.b32.xlu1 %v438_v46, %s921_s20 }
 0x1b5   :  { %605 = vrot.lane.b32.xlu0 %v438_v46, %s919_s1  ;;  %571 = vrot.lane.b32.xlu1 %v438_v46, %s922_s21 }
 0x1b9   :  { %584 = vrot.lane.b32.xlu0 %v438_v46, %s923_s25  ;;  %545 = vrot.lane.b32.xlu1 %v438_v46, %s924_s26 }
 0x1bd   :  { %558 = vrot.lane.b32.xlu0 %v438_v46, %s925_s28  ;;  %508 = vrot.lane.b32.xlu1 %v436_v40, %s902_s23 }
 0x1c1   :  { %580 = vrot.lane.b32.xlu0 %v436_v40, %s923_s25  ;;  %499 = vrot.lane.b32.xlu1 %v436_v40, %s903_s24 }
 0x1c5   :  { %472 = vrot.lane.b32.xlu0 %v436_v40, %s908_s8  ;;  %490 = vrot.lane.b32.xlu1 %v436_v40, %s901_s22 }
 0x1c9   :  { %554 = vrot.lane.b32.xlu0 %v436_v40, %s925_s28  ;;  %481 = vrot.lane.b32.xlu1 %v436_v40, %s907_s7 }
 0x1cd   :  { %454 = vrot.lane.b32.xlu0 %v436_v40, %s912_s11  ;;  %567 = vrot.lane.b32.xlu1 %v436_v40, %s922_s21 }
 0x1d1   :  { %528 = vrot.lane.b32.xlu0 %v436_v40, %s926_s29  ;;  %463 = vrot.lane.b32.xlu1 %v436_v40, %s911_s0 }
 0x1d5   :  { %517 = vrot.lane.b32.xlu0 %v437_v43, %s902_s23  ;;  %541 = vrot.lane.b32.xlu1 %v436_v40, %s924_s26 }
 0x1d9   :  { %519 = vrot.lane.b32.xlu0 %v438_v46, %s902_s23  ;;  %445 = vrot.lane.b32.xlu1 %v436_v40, %s914_s13 }
 0x1dd   :  { %532 = vrot.lane.b32.xlu1 %v438_v46, %s926_s29 }
 0x1e1   :  { %654 = vperm.xlu1 %894, %v651_v47  }
 0x203   :  { %v604_v48 = vpop.permute.xlu1 %603  ;;  %v614_v49 = vpop.permute.xlu0 %613 }
 0x207   :  { %v1093_v50 = vpop.permute.xlu1 %593  ;;  %v1095_v51 = vpop.permute.xlu0 %569 }
 0x20b   :  { %v1097_v52 = vpop.permute.xlu1 %582  ;;  %v1099_v53 = vpop.permute.xlu0 %543 }
 0x20f   :  { %v1101_v54 = vpop.permute.xlu1 %556  ;;  %v498_v55 = vpop.permute.xlu0 %497 }
 0x213   :  { %v1103_v56 = vpop.permute.xlu1 %530  ;;  %v489_v57 = vpop.permute.xlu0 %488 }
 0x217   :  { %v1105_v58 = vpop.permute.xlu0 %479  ;;  %v507_v59 = vpop.permute.xlu1 %506 }
 0x21b   :  { %v1107_v60 = vpop.permute.xlu0 %461  ;;  %v471_v61 = vpop.permute.xlu1 %470 }
 0x21f   :  { %v1109_v62 = vpop.permute.xlu0 %443  ;;  %v1111_v63 = vpop.permute.xlu1 %452 }
 0x223   :  { %v616_v0 = vpop.permute.xlu0 %615  ;;  %v596_v1 = vpop.permute.xlu1 %595 }
 0x224   :  { %v618_v2 = vsel %vm617_vm14, %v614_v49, %v616_v0  ;;  %v598_v3 = vsel %vm597_vm13, %v1093_v50, %v596_v1  ;;  %vm525_vm14 = vcmask 1048064  }
 0x225   :  { %846 = vmatpush3.msra.mxu1 %v618_v2 }
 0x226   :  { %847 = vmatprep.subr.mxu1 %v917_v10 }
 0x227   :  { %v606_v4 = vpop.permute.xlu0 %605  ;;  %v572_v5 = vpop.permute.xlu1 %571 }
 0x228   :  { %v608_v6 = vsel %vm607_vm4, %v604_v48, %v606_v4  ;;  %v575_v7 = vsel %vm573_vm0, %v1095_v51, %v572_v5 }
 0x229   :  { %848 = vmatpush3.msra.mxu1 %v608_v6 }
 0x22a   :  { %849 = vmatprep.subr.mxu1 %v917_v10 }
 0x22b   :  { %v585_v8 = vpop.permute.xlu0 %584  ;;  %v546_v9 = vpop.permute.xlu1 %545  ;;  %850 = vmatpush3.msra.mxu1 %v598_v3 }
 0x22c   :  { %v588_v11 = vsel %vm586_vm6, %v1097_v52, %v585_v8  ;;  %v549_v12 = vsel %vm547_vm5, %v1099_v53, %v546_v9  ;;  %851 = vmatprep.subr.mxu1 %v917_v10 }
 0x22d   :  { %852 = vmatpush3.msra.mxu1 %v588_v11 }
 0x22e   :  { %853 = vmatprep.subr.mxu1 %v917_v10 }
 0x22f   :  { %v559_v13 = vpop.permute.xlu0 %558  ;;  %v509_v14 = vpop.permute.xlu1 %508  ;;  %854 = vmatpush3.msra.mxu1 %v575_v7 }
 0x230   :  { %v562_v15 = vsel %vm560_vm9, %v1101_v54, %v559_v13  ;;  %v510_v16 = vsel %vm114_vm2, %v507_v59, %v509_v14  ;;  %514 = vst.msk [vmem:[#allocation3 + $0xc8] sm:$0xff] %vm240_vm8, %v509_v14  ;;  %855 = vmatprep.subr.mxu1 %v917_v10 }
 0x231   :  { %621 = vst.msk [vmem:[#allocation3 + $0xc8] sm:$0xff] %vm525_vm14, %v614_v49  ;;  %856 = vmatpush3.msra.mxu1 %v562_v15 }
 0x232   :  { %857 = vmatprep.subr.mxu1 %v917_v10 }
 0x233   :  { %v581_v17 = vpop.permute.xlu0 %580  ;;  %v500_v18 = vpop.permute.xlu1 %499  ;;  %858 = vmatpush3.msra.mxu1 %v549_v12 }
 0x234   :  { %v501_v19 = vsel %vm101_vm3, %v498_v55, %v500_v18  ;;  %505 = vst.msk [vmem:[#allocation3 + $0xb0] sm:$0xff] %vm240_vm8, %v500_v18  ;;  %859 = vmatprep.subr.mxu1 %v917_v10  ;;  %v587_v27 = vsel %vm586_vm6, %v581_v17, %v1097_v52  ;;  %v623_v55 = vld [vmem:[%s1199_s3] sm:$0xff] }
 0x235   :  { %611 = vst.msk [vmem:[#allocation3 + $0xb0] sm:$0xff] %vm525_vm14, %v604_v48 }
 0x237   :  { %v473_v20 = vpop.permute.xlu0 %472  ;;  %v491_v21 = vpop.permute.xlu1 %490 }
 0x238   :  { %v474_v22 = vsel %vm64_vm11, %v471_v61, %v473_v20  ;;  %478 = vst.msk [vmem:[#allocation3 + $0x68] sm:$0xff] %vm240_vm8, %v473_v20  ;;  %v492_v23 = vsel %vm87_vm1, %v489_v57, %v491_v21  ;;  %496 = vst.msk [vmem:[#allocation3 + $0x98] sm:$0xff] %vm240_vm8, %v491_v21  ;;  %v649_v24 = vld [vmem:[#allocation3 + $0xc8] sm:$0xff]  ;;  %vm534_vm1 = vcmask 760832  }
 0x239   :  { %601 = vst.msk [vmem:[#allocation3 + $0x98] sm:$0xff] %vm525_vm14, %v1093_v50  ;;  %675 = vmatprep.subr.mxu0 %v649_v24 }
 0x23a   :  { %676 = vmatpush1.msra.mxu0 %v510_v16 }
 0x23b   :  { %v555_v25 = vpop.permute.xlu0 %554  ;;  %v482_v26 = vpop.permute.xlu1 %481 }
 0x23c   :  { %v483_v28 = vsel %vm74_vm10, %v1105_v58, %v482_v26  ;;  %487 = vst.msk [vmem:[#allocation3 + $0x80] sm:$0xff] %vm240_vm8, %v482_v26  ;;  %v646_v29 = vld [vmem:[#allocation3 + $0xb0] sm:$0xff]  ;;  %v561_v37 = vsel %vm560_vm9, %v555_v25, %v1101_v54 }
 0x23d   :  { %591 = vst.msk [vmem:[#allocation3 + $0x80] sm:$0xff] %vm525_vm14, %v587_v27  ;;  %677 = vmatprep.subr.mxu0 %v646_v29 }
 0x23e   :  { %678 = vmatpush1.msra.mxu0 %v501_v19 }
 0x23f   :  { %v455_v30 = vpop.permute.xlu0 %454  ;;  %v568_v31 = vpop.permute.xlu1 %567 }
 0x240   :  { %v456_v32 = vsel %vm44_vm7, %v1111_v63, %v455_v30  ;;  %460 = vst.msk [vmem:[#allocation3 + $0x38] sm:$0xff] %vm240_vm8, %v455_v30  ;;  %v574_v33 = vsel %vm573_vm0, %v568_v31, %v1095_v51  ;;  %v643_v34 = vld [vmem:[#allocation3 + $0x98] sm:$0xff] }
 0x241   :  { %578 = vst.msk [vmem:[#allocation3 + $0x68] sm:$0xff] %vm525_vm14, %v574_v33  ;;  %679 = vmatprep.subr.mxu0 %v643_v34 }
 0x242   :  { %680 = vmatpush1.msra.mxu0 %v492_v23 }
 0x243   :  { %v529_v35 = vpop.permute.xlu0 %528  ;;  %v464_v36 = vpop.permute.xlu1 %463 }
 0x244   :  { %v465_v39 = vsel %vm54_vm15, %v1107_v60, %v464_v36  ;;  %469 = vst.msk [vmem:[#allocation3 + $0x50] sm:$0xff] %vm240_vm8, %v464_v36  ;;  %v640_v40 = vld [vmem:[#allocation3 + $0x80] sm:$0xff]  ;;  %v535_v48 = vsel %vm534_vm1, %v529_v35, %v1103_v56 }
 0x245   :  { %565 = vst.msk [vmem:[#allocation3 + $0x50] sm:$0xff] %vm525_vm14, %v561_v37  ;;  %681 = vmatprep.subr.mxu0 %v640_v40 }
 0x246   :  { %682 = vmatpush1.msra.mxu0 %v483_v28 }
 0x247   :  { %v518_v41 = vpop.permute.xlu0 %517  ;;  %v542_v42 = vpop.permute.xlu1 %541 }
 0x248   :  { %v521_v43 = vsel %vm114_vm2, %v509_v14, %v518_v41  ;;  %v548_v44 = vsel %vm547_vm5, %v542_v42, %v1099_v53  ;;  %v637_v45 = vld [vmem:[#allocation3 + $0x68] sm:$0xff] }
 0x249   :  { %526 = vst.msk [vmem:[#allocation3 + $0x8] sm:$0xff] %vm525_vm14, %v521_v43  ;;  %552 = vst.msk [vmem:[#allocation3 + $0x38] sm:$0xff] %vm525_vm14, %v548_v44  ;;  %683 = vmatprep.subr.mxu0 %v637_v45 }
 0x24a   :  { %684 = vmatpush1.msra.mxu0 %v474_v22 }
 0x24b   :  { %v520_v46 = vpop.permute.xlu0 %519  ;;  %v446_v47 = vpop.permute.xlu1 %445 }
 0x24c   :  { %v522_v49 = vsel %vm114_vm2, %v518_v41, %v520_v46  ;;  %v447_v50 = vsel %vm33_vm12, %v1109_v62, %v446_v47  ;;  %451 = vst.msk [vmem:[#allocation3 + $0x20] sm:$0xff] %vm240_vm8, %v446_v47  ;;  %v634_v51 = vld [vmem:[#allocation3 + $0x50] sm:$0xff]  ;;  %vm657_vm2 = vcmask 588800  }
 0x24d   :  { %539 = vst.msk [vmem:[#allocation3 + $0x20] sm:$0xff] %vm525_vm14, %v535_v48  ;;  %685 = vmatprep.subr.mxu0 %v634_v51 }
 0x24e   :  { %686 = vmatpush1.msra.mxu0 %v465_v39 }
 0x24f   :  { %v533_v52 = vpop.permute.xlu1 %532 }
 0x250   :  { %v536_v53 = vsel %vm534_vm1, %v1103_v56, %v533_v52  ;;  %v631_v54 = vld [vmem:[#allocation3 + $0x38] sm:$0xff]  ;;  %v625_v58 = vld [vmem:[#allocation3 + $0x8] sm:$0xff] }
 0x251   :  { %687 = vmatprep.subr.mxu0 %v631_v54  ;;  %860 = vmatpush3.msra.mxu1 %v536_v53 }
 0x252   :  { %688 = vmatpush1.msra.mxu0 %v456_v32  ;;  %861 = vmatprep.subr.mxu1 %v917_v10 }
 0x253   :  { %862 = vmatpush3.msra.mxu1 %v522_v49 }
 0x254   :  { %v628_v57 = vld [vmem:[#allocation3 + $0x20] sm:$0xff]  ;;  %864 = vmatmul.mubr.msk.f32.vlgmr.msra.gmra.mxu1 %vm657_vm2, %v623_v55 }
 0x255   :  { %689 = vmatprep.subr.mxu0 %v628_v57 }
 0x256   :  { %690 = vmatpush1.msra.mxu0 %v447_v50 }
 0x257   :  { %691 = vmatprep.subr.mxu0 %v625_v58 }
 0x258   :  { %692 = vmatpush1.msra.mxu0 %v1051_v38 }
 0x259   :  { %831 = vmatmul.mubr.msk.f32.vlgmr.msra.gmra.mxu0 %vm657_vm2, %v623_v55 }
 0x25c   :  { %v655_v56 = vpop.permute.xlu1 %654 }
 0x314   :  { %v798_v59 = vpop.f32.mrf.mxu1 }
 0x315   :  { %v799_v60 = vadd.f32 %v798_v59, %v655_v56 }
 0x316   :  { %v865_v61 = vpop.f32.mrf.mxu1 }
 0x317   :  { %v804_v62 = vmax.f32 %v799_v60, 0.0 }
 0x319   :  { %v727_v63 = vpop.f32.mrf.mxu0  ;;  %811 = vrot.lane.b32.xlu1 %v804_v62, %s904_s27 }
 0x31a   :  { %v728_v0 = vadd.f32 %v727_v63, %v655_v56 }
 0x31b   :  { %v729_v10 = vpop.f32.mrf.mxu0 }
 0x31c   :  { %v802_v1 = vmax.f32 %v728_v0, 0.0  ;;  %v730_v2 = vadd.f32 %v729_v10, %v655_v56 }
 0x31e   :  { %v803_v3 = vmax.f32 %v730_v2, 0.0  ;;  %805 = vst [vmem:[%s1200_s5] sm:$0xff] %v802_v1 }
 0x320   :  { %806 = vst.msk [vmem:[%s1200_s5 + $0x8] sm:$0xff] %vm240_vm8, %v803_v3  ;;  %809 = vrot.lane.b32.xlu0 %v803_v3, %s904_s27 }
 0x38b   :  { %v812_v38 = vpop.permute.xlu1 %811 }
 0x38c   :  { %834 = vst.msk [vmem:[%s1200_s5 + $0x18] sm:$0xff] %vm240_vm8, %v812_v38 }
 0x392   :  { %v810_v4 = vpop.permute.xlu0 %809 }
 0x393   :  { %v813_v5 = vsel %vm240_vm8, %v810_v4, %v812_v38 }
 0x394   :  { %833 = vst [vmem:[%s1200_s5 + $0x10] sm:$0xff] %v813_v5 }

</bundles_post_ra>
